<compile_context>
chip_gen: v7x
topology: tpu7x:2x2x1
jax: 0.10.0
libtpu: 0.0.40
codegen_flags: <defaults>
</compile_context>

<pallas_src>
import functools

import jax
import jax.numpy as jnp
from jax import lax
from jax.experimental import pallas as pl
from jax.experimental.pallas import tpu as pltpu


# ----------------------------- Pallas kernel ------------------------------- #

def fused_conv_bn_relu_kernel(w_ref, p_ref, g_ref, b_ref, o_ref, *, inv_m, eps):
    """Fused conv-as-matmul + BatchNorm(batch statistics) + ReLU.

    w_ref : (OC, Kp)  bf16 conv weights (K zero-padded to a multiple of 16)
    p_ref : (Kp, M)   bf16 im2col patches, transposed (M on the lane axis)
    g_ref : (OC, 1)   f32  BN gamma
    b_ref : (OC, 1)   f32  BN beta
    o_ref : (OC, M)   f32  output (lane-dense: M = 512 = 4 x 128 lanes)
    """
    # Conv: a single matmul, bf16 inputs, f32 accumulation on the MXU.
    y = jnp.dot(w_ref[...], p_ref[...], preferred_element_type=jnp.float32)

    # Batch statistics per output channel (rows); cross-lane reduces (XLU).
    mean = jnp.sum(y, axis=-1, keepdims=True) * inv_m           # (OC, 1)
    d = y - mean
    var = jnp.sum(d * d, axis=-1, keepdims=True) * inv_m        # two-pass, robust

    # Hoisted BN affine + ReLU: o = max(y*scale + shift, 0), all f32.
    scale = g_ref[...] * lax.rsqrt(var + eps)                   # (OC, 1)
    shift = b_ref[...] - mean * scale
    o_ref[...] = jnp.maximum(y * scale + shift, 0.0)


# ------------------------------- JAX glue ---------------------------------- #

def circular_pad(x, pad):
    """Exact reproduction of the PyTorch CircularPadding module:
    zero-pad all four sides, then wrap only the width dimension."""
    if pad == 0:
        return x
    x = jnp.pad(x, ((0, 0), (0, 0), (pad, pad), (pad, pad)))
    x = x.at[:, :, :, 0:pad].set(x[:, :, :, -2 * pad:-pad])
    x = x.at[:, :, :, -pad:].set(x[:, :, :, pad:2 * pad])
    return x


def im2col_t(x_pad, kh, kw, stride, oh, ow):
    """Transposed im2col: (K, M) with K order = c-major then (kh, kw), matching
    weight.reshape(OC, C*KH*KW), and M index = n*OH*OW + oh*OW + ow."""
    n, c, _, _ = x_pad.shape
    cols = []
    for i in range(kh):
        for j in range(kw):
            cols.append(x_pad[:, :, i:i + stride * oh:stride, j:j + stride * ow:stride])
    p = jnp.stack(cols, axis=2)                    # (N, C, KH*KW, OH, OW)
    p = p.reshape(n, c * kh * kw, oh, ow)          # (N, K, OH, OW)
    p = p.transpose(1, 0, 2, 3)                    # (K, N, OH, OW)
    return p.reshape(c * kh * kw, n * oh * ow)     # (K, M)


def _round_up(v, mult):
    return ((v + mult - 1) // mult) * mult


@functools.lru_cache(maxsize=1)
def _vmem_limit_bytes():
    # Generation-aware: half of physical VMEM (v5e/v6e: 128 MiB, v7x: 64 MiB
    # per TensorCore), capped at 32 MiB -- far more than this kernel needs.
    try:
        cap = int(pltpu.get_tpu_info().vmem_capacity_bytes)
    except Exception:
        cap = 64 * 1024 * 1024  # conservative fallback (v7x per-TC figure)
    return min(cap // 2, 32 * 1024 * 1024)


@functools.partial(jax.jit, static_argnames=("stride", "padding", "eps"))
def conv_block_forward(x, weight, bias, gamma, beta, stride, padding, eps=1e-5):
    # The conv bias is mathematically cancelled by the batch-mean subtraction
    # of the following training-mode BatchNorm, so it is never computed.
    del bias

    n, c, _, _ = x.shape
    oc, ic, kh, kw = weight.shape
    assert ic == c

    x_pad = circular_pad(x, padding)
    hp, wp = x_pad.shape[2], x_pad.shape[3]
    oh = (hp - kh) // stride + 1
    ow = (wp - kw) // stride + 1

    m = n * oh * ow            # 512 here -> lane-dense (multiple of 128) stores
    k = c * kh * kw            # 36

    # Pad K only to the bf16 sublane-packing multiple (16), not to 128.
    kp = _round_up(k, 16)

    patches_t = im2col_t(x_pad, kh, kw, stride, oh, ow)             # (K, M) f32
    patches_t = jnp.pad(patches_t, ((0, kp - k), (0, 0))).astype(jnp.bfloat16)
    w_t = jnp.pad(weight.reshape(oc, k), ((0, 0), (0, kp - k))).astype(jnp.bfloat16)
    g2 = gamma.astype(jnp.float32).reshape(oc, 1)
    b2 = beta.astype(jnp.float32).reshape(oc, 1)

    # VMEM budget for the fused, fully-resident design (Pallas double-buffers
    # the tiles; there is no scratch).
    vmem_limit = _vmem_limit_bytes()
    vmem_est = 2 * (w_t.size * 2 + patches_t.size * 2
                    + g2.size * 4 + b2.size * 4 + oc * m * 4)
    assert vmem_est < vmem_limit, (
        "problem too large for the single fused kernel; tile M (parallel for "
        "v7x megacore) with per-tile partial statistics instead")

    out = pl.pallas_call(
        functools.partial(fused_conv_bn_relu_kernel, inv_m=1.0 / m, eps=eps),
        out_shape=jax.ShapeDtypeStruct((oc, m), jnp.float32),
        grid_spec=pltpu.PrefetchScalarGridSpec(
            num_scalar_prefetch=0,
            grid=(1,),
            in_specs=[
                pl.BlockSpec((oc, kp), lambda i: (0, 0)),   # weights  (8, 48)
                pl.BlockSpec((kp, m), lambda i: (0, 0)),    # patches  (48, 512)
                pl.BlockSpec((oc, 1), lambda i: (0, 0)),    # gamma    (8, 1)
                pl.BlockSpec((oc, 1), lambda i: (0, 0)),    # beta     (8, 1)
            ],
            out_specs=pl.BlockSpec((oc, m), lambda i: (0, 0)),
        ),
        compiler_params=pltpu.CompilerParams(
            dimension_semantics=("arbitrary",),
            vmem_limit_bytes=vmem_limit,
        ),
    )(w_t, patches_t, g2, b2)

    # (OC, M) -> (N, OC, OH, OW) to match the PyTorch module output.
    return out.reshape(oc, n, oh, ow).transpose(1, 0, 2, 3)


# Pure-JAX f32 reference (with conv bias) for a correctness check.
def reference(x, weight, bias, gamma, beta, stride, padding, eps=1e-5):
    xp = circular_pad(x, padding)
    y = lax.conv_general_dilated(
        xp, weight, window_strides=(stride, stride), padding="VALID",
        dimension_numbers=("NCHW", "OIHW", "NCHW"))
    y = y + bias.reshape(1, -1, 1, 1)
    mean = y.mean(axis=(0, 2, 3), keepdims=True)
    var = ((y - mean) ** 2).mean(axis=(0, 2, 3), keepdims=True)
    y = (y - mean) / jnp.sqrt(var + eps)
    y = y * gamma.reshape(1, -1, 1, 1) + beta.reshape(1, -1, 1, 1)
    return jnp.maximum(y, 0.0)


if __name__ == "__main__":
    key = jax.random.PRNGKey(0)
    k_x, k_w, k_b = jax.random.split(key, 3)

    # ConvBlock(in_channels=4, out_channels=8, kernel_size=3, stride=1, padding=1)
    N, C, H, W = 2, 4, 16, 16
    OC, KS, STRIDE, PAD = 8, 3, 1, 1

    x = jax.random.normal(k_x, (N, C, H, W), dtype=jnp.float32)
    weight = jax.random.normal(k_w, (OC, C, KS, KS), dtype=jnp.float32) * 0.1
    bias = jax.random.normal(k_b, (OC,), dtype=jnp.float32) * 0.1
    gamma = jnp.ones((OC,), jnp.float32)   # BatchNorm2d weight init
    beta = jnp.zeros((OC,), jnp.float32)   # BatchNorm2d bias init

    out = conv_block_forward(x, weight, bias, gamma, beta,
                             stride=STRIDE, padding=PAD)
    out = jax.block_until_ready(out)

    ref = reference(x, weight, bias, gamma, beta, STRIDE, PAD)
    assert out.shape == (N, OC, H, W)
    max_err = float(jnp.max(jnp.abs(out - ref)))
    assert max_err < 5e-2, f"mismatch vs reference: {max_err}"

    print("KERNEL_OK")
</pallas_src>

<mosaic_0001>
module attributes {stable_mosaic.version = 11 : i64} {
  func.func @fused_conv_bn_relu_kernel(%arg0: i32, %arg1: memref<8x48xbf16, #tpu.memory_space<vmem>>, %arg2: memref<48x512xbf16, #tpu.memory_space<vmem>>, %arg3: memref<8x1xf32, #tpu.memory_space<vmem>>, %arg4: memref<8x1xf32, #tpu.memory_space<vmem>>, %arg5: memref<8x512xf32, #tpu.memory_space<vmem>>) attributes {dimension_semantics = [#tpu.dimension_semantics<arbitrary>], iteration_bounds = array<i64: 1>, scalar_prefetch = 0 : i64, scratch_operands = 0 : i64, tpu.core_type = #tpu.core_type<tc>, window_params = [{pipeline_mode = #tpu.pipeline_mode<synchronous>, transform_indices = @transform_0, window_bounds = array<i64: 8, 48>}, {pipeline_mode = #tpu.pipeline_mode<synchronous>, transform_indices = @transform_1, window_bounds = array<i64: 48, 512>}, {pipeline_mode = #tpu.pipeline_mode<synchronous>, transform_indices = @transform_2, window_bounds = array<i64: 8, 1>}, {pipeline_mode = #tpu.pipeline_mode<synchronous>, transform_indices = @transform_3, window_bounds = array<i64: 8, 1>}, {pipeline_mode = #tpu.pipeline_mode<synchronous>, transform_indices = @transform_4, window_bounds = array<i64: 8, 512>}]} {
    %c0 = arith.constant 0 : index
    %c0_0 = arith.constant 0 : index
    %0 = vector.load %arg1[%c0, %c0_0] : memref<8x48xbf16, #tpu.memory_space<vmem>>, vector<8x48xbf16>
    %c0_1 = arith.constant 0 : index
    %c0_2 = arith.constant 0 : index
    %1 = vector.load %arg2[%c0_1, %c0_2] : memref<48x512xbf16, #tpu.memory_space<vmem>>, vector<48x512xbf16>
    %cst = arith.constant dense<0.000000e+00> : vector<8x512xf32>
    %2 = tpu.matmul %0, %1, %cst {dimension_numbers = #tpu.dot_dimension_numbers<[1], [0], [0], [1], [0, 0, 1, 1], [], []>} : vector<8x48xbf16>, vector<48x512xbf16>, vector<8x512xf32> -> vector<8x512xf32>
    %cst_3 = arith.constant dense<0.000000e+00> : vector<8xf32>
    %3 = vector.multi_reduction <add>, %2, %cst_3 [1] : vector<8x512xf32> to vector<8xf32>
    %4 = vector.shape_cast %3 : vector<8xf32> to vector<8x1xf32>
    %cst_4 = arith.constant 0.001953125 : f32
    %5 = vector.broadcast %cst_4 : f32 to vector<8x1xf32>
    %6 = arith.mulf %4, %5 : vector<8x1xf32>
    %7 = vector.broadcast %6 : vector<8x1xf32> to vector<8x512xf32>
    %8 = arith.subf %2, %7 : vector<8x512xf32>
    %9 = arith.mulf %8, %8 : vector<8x512xf32>
    %cst_5 = arith.constant dense<0.000000e+00> : vector<8xf32>
    %10 = vector.multi_reduction <add>, %9, %cst_5 [1] : vector<8x512xf32> to vector<8xf32>
    %11 = vector.shape_cast %10 : vector<8xf32> to vector<8x1xf32>
    %cst_6 = arith.constant 0.001953125 : f32
    %12 = vector.broadcast %cst_6 : f32 to vector<8x1xf32>
    %13 = arith.mulf %11, %12 : vector<8x1xf32>
    %c0_7 = arith.constant 0 : index
    %c0_8 = arith.constant 0 : index
    %14 = vector.load %arg3[%c0_7, %c0_8] : memref<8x1xf32, #tpu.memory_space<vmem>>, vector<8x1xf32>
    %cst_9 = arith.constant 9.99999974E-6 : f32
    %15 = vector.broadcast %cst_9 : f32 to vector<8x1xf32>
    %16 = arith.addf %13, %15 : vector<8x1xf32>
    %17 = math.rsqrt %16 : vector<8x1xf32>
    %18 = arith.mulf %14, %17 : vector<8x1xf32>
    %c0_10 = arith.constant 0 : index
    %c0_11 = arith.constant 0 : index
    %19 = vector.load %arg4[%c0_10, %c0_11] : memref<8x1xf32, #tpu.memory_space<vmem>>, vector<8x1xf32>
    %20 = arith.mulf %6, %18 : vector<8x1xf32>
    %21 = arith.subf %19, %20 : vector<8x1xf32>
    %22 = vector.broadcast %18 : vector<8x1xf32> to vector<8x512xf32>
    %23 = arith.mulf %2, %22 : vector<8x512xf32>
    %24 = vector.broadcast %21 : vector<8x1xf32> to vector<8x512xf32>
    %25 = arith.addf %23, %24 : vector<8x512xf32>
    %cst_12 = arith.constant 0.000000e+00 : f32
    %26 = vector.broadcast %cst_12 : f32 to vector<8x512xf32>
    %27 = arith.maximumf %25, %26 : vector<8x512xf32>
    %c0_13 = arith.constant 0 : index
    %c0_14 = arith.constant 0 : index
    %28 = vector.load %arg5[%c0_13, %c0_14] : memref<8x512xf32, #tpu.memory_space<vmem>>, vector<8x512xf32>
    tpu.vector_store %arg5[%c0_13, %c0_14], %27 {strides = array<i32>} : memref<8x512xf32, #tpu.memory_space<vmem>>, vector<8x512xf32>,
    return
  }
  func.func @transform_0(%arg0: i32) -> (i32, i32) {
    %c0_i32 = arith.constant 0 : i32
    %c0_i32_0 = arith.constant 0 : i32
    %c0_i32_1 = arith.constant 0 : i32
    return %c0_i32, %c0_i32_0 : i32, i32
  }
  func.func @transform_1(%arg0: i32) -> (i32, i32) {
    %c0_i32 = arith.constant 0 : i32
    %c0_i32_0 = arith.constant 0 : i32
    %c0_i32_1 = arith.constant 0 : i32
    return %c0_i32, %c0_i32_0 : i32, i32
  }
  func.func @transform_2(%arg0: i32) -> (i32, i32) {
    %c0_i32 = arith.constant 0 : i32
    %c0_i32_0 = arith.constant 0 : i32
    %c0_i32_1 = arith.constant 0 : i32
    return %c0_i32, %c0_i32_0 : i32, i32
  }
  func.func @transform_3(%arg0: i32) -> (i32, i32) {
    %c0_i32 = arith.constant 0 : i32
    %c0_i32_0 = arith.constant 0 : i32
    %c0_i32_1 = arith.constant 0 : i32
    return %c0_i32, %c0_i32_0 : i32, i32
  }
  func.func @transform_4(%arg0: i32) -> (i32, i32) {
    %c0_i32 = arith.constant 0 : i32
    %c0_i32_0 = arith.constant 0 : i32
    %c0_i32_1 = arith.constant 0 : i32
    return %c0_i32, %c0_i32_0 : i32, i32
  }
}

</mosaic_0001>

<bundles_post_ra>
// kernel: conv_block_forward.1
= control target key start
LH: loop header
LB: loop body
LE: loop exit
PB: predicated region body
PF: predicated region fallthrough
CT: control target
= control target key end

     0   :  { %v271_v1 = vmov 0   ;;  %vm91_vm0 = vcmask 392192   ;;  %s354_s1 = inlined_call_operand.vmem [shape: bf16[48,512], index: 1, kind: input, shape index: {}]   ;;  %s355_s0 = inlined_call_operand.vmem [shape: bf16[8,48], index: 0, kind: input, shape index: {}]   ;;  %s356_s2 = inlined_call_operand.vmem [shape: f32[8,1], index: 2, kind: input, shape index: {}]   ;;  %s357_s3 = inlined_call_operand.vmem [shape: f32[8,1], index: 3, kind: input, shape index: {}]   ;;  %s358_s4 = inlined_call_operand.vmem [shape: f32[8,512], index: 4, kind: output, shape index: {}]  }
   0x1   :  { %v251_v0 = vld [vmem:[%s354_s1 + $0x4] ss:$16 sps:$4 sm:$0xff]   ;;  %127 = vmatprep.mubr.bf16.mxu0 %v271_v1  ;;  %168 = vmatprep.mubr.bf16.mxu1 %v271_v1  ;;  %v253_v2 = vld [vmem:[%s354_s1 + $0xc] ss:$16 sps:$4 sm:$0xff]   ;;  %v255_v3 = vld [vmem:[%s354_s1] ss:$16 sps:$4 sm:$0xff]  }
   0x2   :  { %249 = vset.pattern.permute.xlu1 %v271_v1  ;;  %250 = vset.pattern.permute.xlu0 %v271_v1  ;;  %v256_v4 = vld [vmem:[%s354_s1 + $0x8] ss:$16 sps:$4 sm:$0xff]   ;;  %v257_v5 = vld [vmem:[%s354_s1 + $0x24] ss:$16 sps:$4 sm:$0xff]   ;;  %v259_v6 = vld [vmem:[%s354_s1 + $0x2c] ss:$16 sps:$4 sm:$0xff]  }
   0x3   :  { %95 = vmatprep.subr.bf16.mxu0 %v251_v0  ;;  %136 = vmatprep.subr.bf16.mxu1 %v253_v2  ;;  %v261_v7 = vld [vmem:[%s354_s1 + $0x20] ss:$16 sps:$4 sm:$0xff]   ;;  %v262_v8 = vld [vmem:[%s354_s1 + $0x28] ss:$16 sps:$4 sm:$0xff]   ;;  %v263_v9 = vld [vmem:[%s354_s1 + $0x44] ss:$16 sps:$4 sm:$0xff]  }
   0x4   :  { %96 = vmatpush1.bf16.msra.mxu0 %v255_v3  ;;  %137 = vmatpush1.bf16.msra.mxu1 %v256_v4  ;;  %v265_v10 = vld [vmem:[%s354_s1 + $0x4c] ss:$16 sps:$4 sm:$0xff]   ;;  %v267_v11 = vld [vmem:[%s354_s1 + $0x40] ss:$16 sps:$4 sm:$0xff]   ;;  %v268_v12 = vld [vmem:[%s354_s1 + $0x48] ss:$16 sps:$4 sm:$0xff]  }
   0x5   :  { %97 = vmatprep.subr.bf16.mxu0 %v257_v5  ;;  %138 = vmatprep.subr.bf16.mxu1 %v259_v6  ;;  %v18_v13 = vld [vmem:[%s355_s0] sm:$0xf] }
   0x6   :  { %v197_v41 = vld [vmem:[%s356_s2] sm:$0xff] }
   0x7   :  { %v201_v44 = vld [vmem:[%s357_s3] sm:$0xff] }
   0x8   :  { %98 = vmatpush1.bf16.msra.mxu0 %v261_v7  ;;  %139 = vmatpush1.bf16.msra.mxu1 %v262_v8 }
   0x9   :  { %99 = vmatprep.subr.bf16.mxu0 %v263_v9  ;;  %140 = vmatprep.subr.bf16.mxu1 %v265_v10 }
   0xc   :  { %100 = vmatpush1.bf16.msra.mxu0 %v267_v11  ;;  %141 = vmatpush1.bf16.msra.mxu1 %v268_v12 }
   0xf   :  { %246 = vmatmul.mubr.msk.bf16.vlgmr.msra.gmra.mrb[0].mxu0 %vm91_vm0, %v18_v13  ;;  %247 = vmatmul.mubr.msk.bf16.vlgmr.msra.gmra.mrb[0].mxu1 %vm91_vm0, %v18_v13 }
  0xe2   :  { %v129_v14 = vpop.f32.mrb[0].mxu0  ;;  %v170_v15 = vpop.f32.mrb[0].mxu1 }
  0xe3   :  { %v131_v16 = vpop.f32.mrb[1].mxu0  ;;  %v172_v17 = vpop.f32.mrb[1].mxu1 }
  0xe4   :  { %v177_v18 = vadd.f32 %v131_v16, %v129_v14  ;;  %v133_v19 = vpop.f32.mrb[2].mxu0  ;;  %v174_v20 = vpop.f32.mrb[2].mxu1 }
  0xe5   :  { %v134_v21 = vpop.f32.mrb[3].mxu0  ;;  %v175_v22 = vpop.f32.mrb[3].mxu1 }
  0xe6   :  { %v178_v23 = vadd.f32 %v177_v18, %v170_v15 }
  0xe8   :  { %v179_v24 = vadd.f32 %v178_v23, %v172_v17 }
  0xea   :  { %180 = vadd.xlane.f32.xlu0 %v179_v24 }
 0x177   :  { %v181_v25 = vpop.xlane.xlu0 %180 }
 0x178   :  { %v182_v26 = vmul.f32 0.001953125, %v181_v25 }
 0x17a   :  { %v183_v27 = vsub.f32 %v129_v14, %v182_v26  ;;  %v184_v28 = vsub.f32 %v131_v16, %v182_v26  ;;  %v185_v29 = vsub.f32 %v170_v15, %v182_v26  ;;  %v186_v30 = vsub.f32 %v172_v17, %v182_v26 }
 0x17c   :  { %v187_v31 = vmul.f32 %v183_v27, %v183_v27  ;;  %v188_v32 = vmul.f32 %v184_v28, %v184_v28  ;;  %v189_v33 = vmul.f32 %v185_v29, %v185_v29  ;;  %v190_v35 = vmul.f32 %v186_v30, %v186_v30 }
 0x17e   :  { %v191_v34 = vadd.f32 %v188_v32, %v187_v31 }
 0x180   :  { %v192_v36 = vadd.f32 %v191_v34, %v189_v33 }
 0x182   :  { %v193_v37 = vadd.f32 %v192_v36, %v190_v35 }
 0x184   :  { %194 = vadd.xlane.f32.xlu0 %v193_v37 }
 0x211   :  { %v195_v38 = vpop.xlane.xlu0 %194 }
 0x212   :  { %v196_v39 = vmul.f32 0.001953125, %v195_v38 }
 0x214   :  { %v198_v40 = vadd.f32 1e-05, %v196_v39 }
 0x216   :  { %269 = vrsqrt.f32 %v198_v40 }
 0x220   :  { %v270_v42 = vpop.eup %269 }
 0x221   :  { %v200_v43 = vmul.f32 %v270_v42, %v197_v41 }
 0x223   :  { %206 = vperm.xlu1 %249, %v200_v43   ;;  %v202_v45 = vmul.f32 %v200_v43, %v182_v26 }
 0x225   :  { %v203_v46 = vsub.f32 %v201_v44, %v202_v45 }
 0x227   :  { %215 = vperm.xlu1 %249, %v203_v46  }
 0x2a2   :  { %v207_v47 = vpop.permute.xlu1 %206 }
 0x2a3   :  { %v209_v48 = vmul.f32 %v207_v47, %v129_v14  ;;  %v210_v49 = vmul.f32 %v207_v47, %v131_v16  ;;  %v211_v50 = vmul.f32 %v207_v47, %v170_v15  ;;  %v212_v51 = vmul.f32 %v207_v47, %v172_v17 }
 0x2a6   :  { %v216_v52 = vpop.permute.xlu1 %215 }
 0x2a7   :  { %v218_v53 = vadd.f32 %v216_v52, %v209_v48  ;;  %v219_v54 = vadd.f32 %v216_v52, %v210_v49  ;;  %v220_v55 = vadd.f32 %v216_v52, %v211_v50  ;;  %v221_v56 = vadd.f32 %v216_v52, %v212_v51 }
 0x2a9   :  { %v222_v57 = vmax.f32 %v218_v53, 0.0  ;;  %v223_v58 = vmax.f32 %v219_v54, 0.0  ;;  %v224_v59 = vmax.f32 %v220_v55, 0.0  ;;  %v225_v60 = vmax.f32 %v221_v56, 0.0 }
 0x2ab   :  { %226 = vst [vmem:[%s358_s4] sm:$0xff] %v222_v57  ;;  %227 = vst [vmem:[%s358_s4 + $0x8] sm:$0xff] %v223_v58 }
 0x2ac   :  { %228 = vst [vmem:[%s358_s4 + $0x10] sm:$0xff] %v224_v59  ;;  %229 = vst [vmem:[%s358_s4 + $0x18] sm:$0xff] %v225_v60 }

</bundles_post_ra>
